<compile_context>
chip_gen: v5e
topology: v5e:2x2
jax: 0.10.0
libtpu: 0.0.40
codegen_flags: <defaults>
</compile_context>

<pallas_src>
import jax
import jax.numpy as jnp
from jax.experimental import pallas as pl
from jax.experimental.pallas import tpu as pltpu


def _guided_dropout2d_kernel(x_ref, s_ref, o_ref):
    # x_ref: (tc, thw) tile of one sample; s_ref: (tc, 1) per-channel f32 scale.
    # Compute in f32, cast only on store (PyTorch type-promotion behavior).
    o_ref[...] = (x_ref[...].astype(jnp.float32) * s_ref[...]).astype(o_ref.dtype)


def _sublane_pack(itemsize):
    # Packed sublane rows per vreg: 8 for 4-byte, 16 for 2-byte, 32 for 1-byte.
    return max(8, 32 // max(1, itemsize))


def _choose_tiles(n, c, hw, itemsize, target_bytes=4 * 1024 * 1024):
    pack = _sublane_pack(itemsize)

    # Lane (spatial) tile: multiple of 128 when H*W allows it, else full extent.
    if hw % 128 == 0:
        max_lanes = max(128, ((target_bytes // (pack * itemsize)) // 128) * 128)
        thw = min(hw, max_lanes)
    else:
        # TODO(synk): H*W that is both huge and not a multiple of 128 keeps the
        # full spatial extent on the lane axis (masked stores); tiling that case
        # would require lane-axis padding of x in the wrapper.
        thw = hw

    # Channel tile: as many packed rows as fit in the byte budget.
    max_rows = max(1, target_bytes // max(1, thw * itemsize))
    tc = min(c, max_rows)
    if tc < c:
        tc = max(pack, (tc // pack) * pack)
        tc = min(tc, c)

    # Keep >= 2 grid steps when possible so v7x's second TensorCore has work.
    if n == 1 and tc == c and thw == hw:
        if c >= 2 * pack:
            tc = max(pack, (((c + 1) // 2) // pack) * pack)
        elif hw % 256 == 0:
            thw = hw // 2
    return tc, thw


def _vmem_limit(tc, thw, x_itemsize, out_itemsize):
    x_tile = tc * thw * x_itemsize
    o_tile = tc * thw * out_itemsize
    s_tile = ((tc + 7) // 8) * 8 * 128 * 4  # (tc, 1) f32 padded to (8,128) tiles
    need = 2 * (x_tile + o_tile + s_tile) + (2 << 20)  # 2-deep buffers + headroom
    return int(max(4 << 20, min(need, 32 << 20)))


@jax.jit
def guided_dropout_2d(x, t):
    """Forward of GuidedDropout2D: y[n, c, h, w] = x[n, c, h, w] * t[c]."""
    n, c, h, w = x.shape
    assert t.shape == (c,), "channel axis of x must equal dim (view(1,-1,1,1))"
    hw = h * w

    out_dtype = jnp.promote_types(x.dtype, t.dtype)
    x3 = x.reshape(n, c, hw)                      # free row-major reshape
    scale = t.reshape(c, 1).astype(jnp.float32)   # tiny; reused for every sample

    tc, thw = _choose_tiles(n, c, hw, x.dtype.itemsize)
    grid = (n, pl.cdiv(c, tc), pl.cdiv(hw, thw))

    out = pl.pallas_call(
        _guided_dropout2d_kernel,
        out_shape=jax.ShapeDtypeStruct((n, c, hw), out_dtype),
        grid=grid,
        in_specs=[
            pl.BlockSpec((None, tc, thw), lambda i, j, k: (i, j, k)),
            pl.BlockSpec((tc, 1), lambda i, j, k: (j, 0)),
        ],
        out_specs=pl.BlockSpec((None, tc, thw), lambda i, j, k: (i, j, k)),
        compiler_params=pltpu.CompilerParams(
            dimension_semantics=("parallel", "parallel", "parallel"),
            vmem_limit_bytes=_vmem_limit(
                tc, thw, x.dtype.itemsize, jnp.dtype(out_dtype).itemsize
            ),
        ),
    )(x3, scale)
    return out.reshape(n, c, h, w)


if __name__ == "__main__":
    # NCHW, matching GuidedDropout2D: batch=2, channels(dim)=4, spatial=16x16.
    batch, channels, spatial = 2, 4, 16
    drop_rate = 0.2  # unused in forward (begin_flag=False), kept for parity

    key = jax.random.PRNGKey(0)
    kx, kt = jax.random.split(key)

    x = jax.random.normal(kx, (batch, channels, spatial, spatial), dtype=jnp.float32)
    # nn.Parameter(torch.FloatTensor(dim).uniform_(0, 1)) -> uniform[0,1) per channel.
    t = jax.random.uniform(kt, (channels,), dtype=jnp.float32, minval=0.0, maxval=1.0)

    y = jax.block_until_ready(guided_dropout_2d(x, t))

    # Cross-check against plain JAX per-channel broadcast multiply.
    y_ref = x * t[None, :, None, None]
    assert y.shape == x.shape, "shape mismatch vs input"
    assert jnp.allclose(y, y_ref, atol=1e-6, rtol=1e-6), "mismatch vs reference"

    print("KERNEL_OK")
</pallas_src>

<mosaic_0001>
module attributes {stable_mosaic.version = 11 : i64} {
  func.func @_guided_dropout2d_kernel(%arg0: i32, %arg1: i32, %arg2: i32, %arg3: memref<1x4x256xf32, #tpu.memory_space<vmem>>, %arg4: memref<4x1xf32, #tpu.memory_space<vmem>>, %arg5: memref<1x4x256xf32, #tpu.memory_space<vmem>>) attributes {dimension_semantics = [#tpu.dimension_semantics<parallel>, #tpu.dimension_semantics<parallel>, #tpu.dimension_semantics<parallel>], iteration_bounds = array<i64: 2, 1, 1>, scalar_prefetch = 0 : i64, scratch_operands = 0 : i64, tpu.core_type = #tpu.core_type<tc>, window_params = [{transform_indices = @transform_0, window_bounds = array<i64: 1, 4, 256>}, {transform_indices = @transform_1, window_bounds = array<i64: 4, 1>}, {transform_indices = @transform_2, window_bounds = array<i64: 1, 4, 256>}]} {
    %c0 = arith.constant 0 : index
    %c0_0 = arith.constant 0 : index
    %c0_1 = arith.constant 0 : index
    %0 = vector.load %arg3[%c0, %c0_0, %c0_1] : memref<1x4x256xf32, #tpu.memory_space<vmem>>, vector<1x4x256xf32>
    %1 = vector.shape_cast %0 : vector<1x4x256xf32> to vector<4x256xf32>
    %c0_2 = arith.constant 0 : index
    %c0_3 = arith.constant 0 : index
    %2 = vector.load %arg4[%c0_2, %c0_3] : memref<4x1xf32, #tpu.memory_space<vmem>>, vector<4x1xf32>
    %3 = vector.broadcast %2 : vector<4x1xf32> to vector<4x256xf32>
    %4 = arith.mulf %1, %3 : vector<4x256xf32>
    %c0_4 = arith.constant 0 : index
    %c0_5 = arith.constant 0 : index
    %c0_6 = arith.constant 0 : index
    %5 = vector.load %arg5[%c0_4, %c0_5, %c0_6] : memref<1x4x256xf32, #tpu.memory_space<vmem>>, vector<1x4x256xf32>
    %6 = vector.shape_cast %5 : vector<1x4x256xf32> to vector<4x256xf32>
    %7 = vector.shape_cast %4 : vector<4x256xf32> to vector<1x4x256xf32>
    tpu.vector_store %arg5[%c0_4, %c0_5, %c0_6], %7 {strides = array<i32>} : memref<1x4x256xf32, #tpu.memory_space<vmem>>, vector<1x4x256xf32>,
    return
  }
  func.func @transform_0(%arg0: i32, %arg1: i32, %arg2: i32) -> (i32, i32, i32) {
    %c0_i32 = arith.constant 0 : i32
    return %arg0, %arg1, %arg2 : i32, i32, i32
  }
  func.func @transform_1(%arg0: i32, %arg1: i32, %arg2: i32) -> (i32, i32) {
    %c0_i32 = arith.constant 0 : i32
    %c0_i32_0 = arith.constant 0 : i32
    return %arg1, %c0_i32 : i32, i32
  }
  func.func @transform_2(%arg0: i32, %arg1: i32, %arg2: i32) -> (i32, i32, i32) {
    %c0_i32 = arith.constant 0 : i32
    return %arg0, %arg1, %arg2 : i32, i32, i32
  }
}

</mosaic_0001>

<bundles_post_ra>
// kernel: guided_dropout_2d.1
= control target key start
LH: loop header
LB: loop body
LE: loop exit
PB: predicated region body
PF: predicated region fallthrough
CT: control target
= control target key end

     0   :  { %s453_s9 = smov 0   ;;  %s455_s10 = smov 0   ;;  %s482_s0 = inlined_call_operand.vmem [shape: f32[2,4,256], index: 0, kind: input, shape index: {}]   ;;  %s483_s1 = inlined_call_operand.vmem [shape: f32[4,1], index: 1, kind: input, shape index: {}]   ;;  %s484_s2 = inlined_call_operand.vmem [shape: f32[2,4,256], index: 2, kind: output, shape index: {}]  }
   0x1   :  { %s457_s11 = smov 0  }
   0x2 LB: > { %s31_s12 = sadd.s32 1, %s430_s10  ;;  %p376_p0 = scmp.ge.s32.totalorder %s434_s11, 1  ;;  %s434_s11 = sphi %s457_s11, %s12_s11   ;;  %s430_s10 = sphi %s455_s10, %s486_s10   ;;  %s426_s9 = sphi %s453_s9, %s485_s9  }
   0x3   : > { %p33_p1 = scmp.ge.s32.totalorder %s31_s12, 2  ;;  %p157_p2 = scmp.lt.s32.totalorder %s434_s11, 3 }
   0x5   : > { %s488_s12 = smov (%p33_p1, %s31_s12), 0  ;;  %p158_p3 = pnand %p376_p0, %p157_p2 }
   0x6   : > { %p200_p4 = scmp.lt.s32.totalorder (!%p158_p3), %s426_s9, 1 }
   0x7   : > { %161 = sbr.rel (%p158_p3) target bundleno = 134 (0x86), region = 28 }
   0xc   : > { %v232_v0 = vld [vmem:[%s483_s1] sm:$0xf]  ;;  %v436_v1 = vmov 0   ;;  %s490_s9 = smov (!%p200_p4, %s426_s9), 1  ;;  %v437_v2 = vmov 839922192  }
   0xd   : > { %411 = vset.pattern.permute.xlu0 %v436_v1  ;;  %v238_v3 = vunpack.c.l.s4 %v437_v2  ;;  %s383_s15 = sshll.u32 %s490_s9, 3 }
   0xe   : > { %235 = vperm.xlu0 %411, %v232_v0   ;;  %s211_s18 = scalar_lea.vmem %s482_s0, %s383_s15  ;;  %s229_s21 = scalar_lea.vmem %s484_s2, %s383_s15 }
   0xf   : > { %v239_v4 = vunpack.c.0.s8 %v238_v3  ;;  %v231_v6 = vld [vmem:[%s211_s18] sm:$0xff] }
  0x80   : > { %v236_v5 = vpop.permute.xlu0 %235 }
  0x81   : > { %v240_v7 = vperm.slane %v236_v5, %v239_v4 }
  0x83   : > { %v242_v8 = vmul.f32 %v240_v7, %v231_v6 }
  0x85   : > { %243 = vst [vmem:[%s229_s21] sm:$0xff] %v242_v8 }
  0x86 PF: > { %s12_s11 = sadd.s32 1, %s434_s11   ;;  %s485_s9 = smov %s430_s10 }
  0x87   : > { %p9_p5 = scmp.ge.s32.totalorder %s12_s11, 4   ;;  %s486_s10 = smov %s488_s12 }
  0x89   :  { %11 = sbr.rel (!%p9_p5) target bundleno = 2 (0x2), region = 61 }

</bundles_post_ra>
